<compile_context>
chip_gen: v6e
topology: v6e:2x2x1
jax: 0.10.0
libtpu: 0.0.40
codegen_flags: <defaults>
</compile_context>

<pallas_src>
import functools

import numpy as np
import jax
import jax.numpy as jnp
from jax import lax
from jax.experimental import pallas as pl
from jax.experimental.pallas import tpu as pltpu

LANE = 128           # lane width: sequence dim padded up to a multiple of this
ROW_ALIGN = 8        # sublane granularity
MAX_TILE_ROWS = 128  # upper bound on rows per grid tile
IDX_LANES = 128      # lane-dense packing of the two scalar index outputs
INV_T = 100.0        # 1 / t  (t = 0.01 in the reference module)


def _round_up(n, m):
    return ((n + m - 1) // m) * m


_NOISE_DTYPE = None


def _get_noise_dtype():
    """bf16 EUP chain on v6e/v7x (2x packed transcendental rate); f32 on v5e
    and on non-TPU backends (CPU interpret does not care)."""
    global _NOISE_DTYPE
    if _NOISE_DTYPE is None:
        try:
            kind = jax.devices()[0].device_kind.lower()
        except Exception:
            kind = ""
        _NOISE_DTYPE = jnp.bfloat16 if ("v6" in kind or "v7" in kind) else jnp.float32
    return _NOISE_DTYPE


def _pick_tile_rows(batch, lanes):
    """Large row tiles amortize the ~0.35us/grid-step overhead; keep >=2 tiles
    when the batch allows it (v7x megacore) and stay well inside VMEM."""
    rows = _round_up(max(batch, 1), ROW_ALIGN)
    if rows > ROW_ALIGN:
        rows = _round_up((rows + 1) // 2, ROW_ALIGN)      # >= 2 grid tiles
    rows = min(rows, MAX_TILE_ROWS)
    # ~14 live full-width f32 temporaries per tile; keep them under ~24 MiB
    # (safe for v7x's 64 MiB VMEM / 32 MiB scoped default).
    vmem_cap = max(ROW_ALIGN, (24 * 2**20) // (lanes * 4 * 14))
    vmem_cap = (vmem_cap // ROW_ALIGN) * ROW_ALIGN
    return max(ROW_ALIGN, min(rows, vmem_cap))


def _sampling_kernel(a_ref, seqlen_ref, noise_ref,
                     len1_ref, len2_ref, idx_ref, *, noise_dtype):
    R, Lp = len1_ref.shape

    a = a_ref[0, 0]                           # learnable scalar (init 3/8), SMEM
    seq_len = seqlen_ref[...]                 # (R, 1) int32, fully dynamic
    L = seq_len.astype(jnp.float32)

    lane = lax.broadcasted_iota(jnp.int32, (R, Lp), 1)
    lane_f = lane.astype(jnp.float32)
    valid = lane < seq_len                    # (R, Lp)

    # p = a*(L-2)/L + 3/4 - a/3 (per row);  smp[i] = p^i (1-p) / (1 - p^L)
    p = a * (L - 2.0) / L + 0.75 - a * (1.0 / 3.0)
    log_p = jnp.log(p)
    denom = 1.0 - jnp.exp(L * log_p)
    smp = jnp.exp(lane_f * log_p) * ((1.0 - p) / denom)     # == smp_list_1

    # Gumbel-style noise: both draws from ONE fused log(-log(u)) pass.
    # flip(softmax(smp_list_2 - eps)) == softmax(smp_list_1 - flip(eps)) and
    # eps is i.i.d., so fresh noise + smp_list_1 serves both branches.
    u = noise_ref[...].astype(noise_dtype)                  # (R, 2*Lp)
    if noise_dtype == jnp.bfloat16:
        lo, hi = 2.0 ** -24, 1.0 - 2.0 ** -8                # keep u strictly in (0,1)
    else:
        lo, hi = 2.0 ** -24, 1.0 - 2.0 ** -24
    u = jnp.clip(u, jnp.asarray(lo, noise_dtype), jnp.asarray(hi, noise_dtype))
    eps = jnp.log(-jnp.log(u)).astype(jnp.float32)
    eps1 = eps[:, :Lp]
    eps2 = eps[:, Lp:]

    neg_inf = jnp.float32(-jnp.inf)
    lg1 = jnp.where(valid, (smp - eps1) * jnp.float32(INV_T), neg_inf)
    lg2 = jnp.where(valid, (smp - eps2) * jnp.float32(INV_T), neg_inf)

    # Row-wise logit max: reused for softmax, argmax and the fallback test.
    m1 = jnp.max(lg1, axis=-1, keepdims=True)
    m2 = jnp.max(lg2, axis=-1, keepdims=True)

    # argmax on logits (exp monotonic); first-max tie-break like torch.argmax.
    big = jnp.int32(Lp)
    seq_1_end = jnp.min(jnp.where(lg1 == m1, lane, big), axis=-1, keepdims=True)
    seq_2_begin = jnp.min(jnp.where(lg2 == m2, lane, big), axis=-1, keepdims=True)
    # TODO(synk): torch.argmax on an all-NaN softmax is implementation-defined;
    # here the (never-hit in practice) fallback indices are clamped to [0, L).
    seq_1_end = jnp.minimum(jnp.maximum(seq_1_end, 0), seq_len - 1)
    seq_2_begin = jnp.minimum(jnp.maximum(seq_2_begin, 0), seq_len - 1)

    # Temperature softmax (1/t already folded into the logits).
    e1 = jnp.exp(lg1 - m1)
    e2 = jnp.exp(lg2 - m2)
    l1 = e1 / jnp.sum(e1, axis=-1, keepdims=True)
    l2 = e2 / jnp.sum(e2, axis=-1, keepdims=True)

    pad1 = jnp.where((lane < seq_1_end) & valid, 1.0, 0.0)
    pad2 = jnp.where((lane > seq_2_begin) & valid, 1.0, 0.0)

    # NaN fallback (len = ones): the softmax can only go non-finite when the
    # masked logit max is +/-inf or NaN -- one scalar-per-row test on m.
    ones_valid = jnp.where(valid, 1.0, 0.0)
    fb1 = ~(jnp.abs(m1) < jnp.float32(jnp.inf))
    fb2 = ~(jnp.abs(m2) < jnp.float32(jnp.inf))

    len1_ref[...] = jnp.where(fb1, ones_valid, l1 + pad1)
    len2_ref[...] = jnp.where(fb2, ones_valid, l2 + pad2)

    # Lane-dense int32 index output: lane 0 = seq_1_end, lane 1 = seq_2_begin.
    lane_i = lax.broadcasted_iota(jnp.int32, (R, IDX_LANES), 1)
    idx_ref[...] = jnp.where(lane_i == 0, seq_1_end,
                             jnp.where(lane_i == 1, seq_2_begin, jnp.int32(0)))


@functools.partial(jax.jit, static_argnames=("lanes", "tile_rows", "noise_dtype"))
def _run_kernel(a, key, seq_lens, lanes, tile_rows, noise_dtype):
    a = jnp.reshape(jnp.asarray(a, jnp.float32), (1, 1))
    seq_lens = jnp.asarray(seq_lens, jnp.int32)
    B = seq_lens.shape[0]
    n_tiles = B // tile_rows
    # Uniform noise for both draws: eps1 lanes [0,Lp), eps2 lanes [Lp,2Lp).
    noise = jax.random.uniform(key, (B, 2 * lanes), dtype=jnp.float32)
    kernel = functools.partial(_sampling_kernel, noise_dtype=noise_dtype)
    return pl.pallas_call(
        kernel,
        grid=(n_tiles,),
        out_shape=(
            jax.ShapeDtypeStruct((B, lanes), jnp.float32),    # len_1 (lane-padded)
            jax.ShapeDtypeStruct((B, lanes), jnp.float32),    # len_2 (lane-padded)
            jax.ShapeDtypeStruct((B, IDX_LANES), jnp.int32),  # [end1, begin2, 0..]
        ),
        in_specs=[
            pl.BlockSpec(memory_space=pltpu.MemorySpace.SMEM),       # a (1,1)
            pl.BlockSpec((tile_rows, 1), lambda i: (i, 0)),          # seq_len
            pl.BlockSpec((tile_rows, 2 * lanes), lambda i: (i, 0)),  # noise
        ],
        out_specs=(
            pl.BlockSpec((tile_rows, lanes), lambda i: (i, 0)),
            pl.BlockSpec((tile_rows, lanes), lambda i: (i, 0)),
            pl.BlockSpec((tile_rows, IDX_LANES), lambda i: (i, 0)),
        ),
        compiler_params=pltpu.CompilerParams(
            dimension_semantics=("parallel",)),   # batch tiles split over TCs
    )(a, seq_lens, noise)


def sampling_forward_batch(a_param, total_len, batch, rng_np, key):
    """`batch` independent Sampling.forward(total_len) draws, one kernel call."""
    # Host-side random interval selection (same rejection rule as the torch code).
    begins, ends, lens = [], [], []
    for _ in range(batch):
        b = int(rng_np.integers(0, total_len))
        e = int(rng_np.integers(0, total_len))
        while abs(b - e + 1) < 4:
            e = int(rng_np.integers(0, total_len))
        if b > e:
            b, e = e, b
        begins.append(b)
        ends.append(e)
        lens.append(e - b + 1)

    lanes = max(LANE, _round_up(total_len, LANE))
    tile_rows = _pick_tile_rows(batch, lanes)
    B = _round_up(max(batch, 1), tile_rows)
    sl = np.full((B, 1), 4, dtype=np.int32)        # padded rows: harmless length
    sl[:batch, 0] = np.asarray(lens, dtype=np.int32)

    outs = _run_kernel(a_param, key, jnp.asarray(sl), lanes=lanes,
                       tile_rows=tile_rows, noise_dtype=_get_noise_dtype())
    outs = jax.block_until_ready(outs)             # single sync point
    len1, len2, idx = (np.asarray(o) for o in outs)

    results = []
    for i in range(batch):
        L = lens[i]
        results.append((begins[i], int(idx[i, 0]), int(idx[i, 1]), ends[i],
                        len1[i, :L], len2[i, :L]))
    return results


def sampling_forward(a_param, total_len, rng_np, key):
    """Mirrors Sampling.forward(total_len) for a single draw."""
    return sampling_forward_batch(a_param, total_len, 1, rng_np, key)[0]


if __name__ == "__main__":
    # deterministic parameter init: a = Parameter([3/8])
    a_param = jnp.array(3.0 / 8.0, dtype=jnp.float32)

    total_len = 16
    rng_np = np.random.default_rng(0)              # host randint rejection loop
    key = jax.random.PRNGKey(0)

    # 8 independent Sampling.forward(total_len) draws fused into one pallas_call.
    batch = 8
    key, sub = jax.random.split(key)
    results = sampling_forward_batch(a_param, total_len, batch, rng_np, sub)

    for (seq_begin, seq_1_end, seq_2_begin, seq_end, len_1, len_2) in results:
        seq_len = seq_end - seq_begin + 1
        assert 0 <= seq_begin <= seq_end < total_len
        assert len_1.shape == (seq_len,) and len_2.shape == (seq_len,)
        assert 0 <= seq_1_end < seq_len and 0 <= seq_2_begin < seq_len
        assert not np.any(np.isnan(len_1)) and not np.any(np.isnan(len_2))
        # structure: softmax mass (~1) plus the padding ones
        assert np.all(len_1[:seq_1_end] >= 1.0 - 1e-3)
        assert np.all(len_2[seq_2_begin + 1:] >= 1.0 - 1e-3)
        assert abs(float(np.sum(len_1)) - seq_1_end - 1.0) < 5e-2
        assert abs(float(np.sum(len_2)) - (seq_len - 1 - seq_2_begin) - 1.0) < 5e-2

    # single-draw API (matches the module's forward return signature) -- reuses
    # the same compiled kernel, so no recompile despite a new seq_len.
    key, sub = jax.random.split(key)
    single = sampling_forward(a_param, total_len, rng_np, sub)
    assert single[4].shape[0] == single[3] - single[0] + 1

    print("KERNEL_OK")
</pallas_src>

<mosaic_0001>
module attributes {stable_mosaic.version = 11 : i64} {
  func.func @_sampling_kernel(%arg0: i32, %arg1: memref<1x1xf32, #tpu.memory_space<smem>>, %arg2: memref<8x1xi32, #tpu.memory_space<vmem>>, %arg3: memref<8x256xf32, #tpu.memory_space<vmem>>, %arg4: memref<8x128xf32, #tpu.memory_space<vmem>>, %arg5: memref<8x128xf32, #tpu.memory_space<vmem>>, %arg6: memref<8x128xi32, #tpu.memory_space<vmem>>) attributes {dimension_semantics = [#tpu.dimension_semantics<parallel>], iteration_bounds = array<i64: 1>, scalar_prefetch = 0 : i64, scratch_operands = 0 : i64, tpu.core_type = #tpu.core_type<tc>, window_params = [{transform_indices = @transform_0, window_bounds = array<i64: 1, 1>}, {transform_indices = @transform_1, window_bounds = array<i64: 8, 1>}, {transform_indices = @transform_2, window_bounds = array<i64: 8, 256>}, {transform_indices = @transform_3, window_bounds = array<i64: 8, 128>}, {transform_indices = @transform_4, window_bounds = array<i64: 8, 128>}, {transform_indices = @transform_5, window_bounds = array<i64: 8, 128>}]} {
    %c0 = arith.constant 0 : index
    %c0_0 = arith.constant 0 : index
    %0 = memref.load %arg1[%c0, %c0_0] : memref<1x1xf32, #tpu.memory_space<smem>>
    %c0_1 = arith.constant 0 : index
    %c0_2 = arith.constant 0 : index
    %1 = vector.load %arg2[%c0_1, %c0_2] : memref<8x1xi32, #tpu.memory_space<vmem>>, vector<8x1xi32>
    %2 = arith.sitofp %1 : vector<8x1xi32> to vector<8x1xf32>
    %3 = tpu.iota {dimensions = array<i32: 1>} : vector<8x128xi32>
    %4 = arith.sitofp %3 : vector<8x128xi32> to vector<8x128xf32>
    %5 = vector.broadcast %1 : vector<8x1xi32> to vector<8x128xi32>
    %6 = arith.cmpi slt, %3, %5 : vector<8x128xi32>
    %cst = arith.constant 2.000000e+00 : f32
    %7 = vector.broadcast %cst : f32 to vector<8x1xf32>
    %8 = arith.subf %2, %7 : vector<8x1xf32>
    %9 = vector.broadcast %0 : f32 to vector<8x1xf32>
    %10 = arith.mulf %9, %8 : vector<8x1xf32>
    %11 = arith.divf %10, %2 : vector<8x1xf32>
    %cst_3 = arith.constant 7.500000e-01 : f32
    %12 = vector.broadcast %cst_3 : f32 to vector<8x1xf32>
    %13 = arith.addf %11, %12 : vector<8x1xf32>
    %cst_4 = arith.constant 0.333333343 : f32
    %14 = arith.mulf %0, %cst_4 : f32
    %15 = vector.broadcast %14 : f32 to vector<8x1xf32>
    %16 = arith.subf %13, %15 : vector<8x1xf32>
    %17 = math.log %16 : vector<8x1xf32>
    %18 = arith.mulf %2, %17 : vector<8x1xf32>
    %19 = math.exp %18 : vector<8x1xf32>
    %cst_5 = arith.constant 1.000000e+00 : f32
    %20 = vector.broadcast %cst_5 : f32 to vector<8x1xf32>
    %21 = arith.subf %20, %19 : vector<8x1xf32>
    %22 = vector.broadcast %17 : vector<8x1xf32> to vector<8x128xf32>
    %23 = arith.mulf %4, %22 : vector<8x128xf32>
    %24 = math.exp %23 : vector<8x128xf32>
    %cst_6 = arith.constant 1.000000e+00 : f32
    %25 = vector.broadcast %cst_6 : f32 to vector<8x1xf32>
    %26 = arith.subf %25, %16 : vector<8x1xf32>
    %27 = arith.divf %26, %21 : vector<8x1xf32>
    %28 = vector.broadcast %27 : vector<8x1xf32> to vector<8x128xf32>
    %29 = arith.mulf %24, %28 : vector<8x128xf32>
    %c0_7 = arith.constant 0 : index
    %c0_8 = arith.constant 0 : index
    %30 = vector.load %arg3[%c0_7, %c0_8] : memref<8x256xf32, #tpu.memory_space<vmem>>, vector<8x256xf32>
    %cst_9 = arith.constant 5.96046448E-8 : f32
    %cst_10 = arith.constant 0.99999994 : f32
    %31 = vector.broadcast %cst_9 : f32 to vector<8x256xf32>
    %32 = arith.maximumf %31, %30 : vector<8x256xf32>
    %33 = vector.broadcast %cst_10 : f32 to vector<8x256xf32>
    %34 = arith.minimumf %33, %32 : vector<8x256xf32>
    %35 = math.log %34 : vector<8x256xf32>
    %cst_11 = arith.constant 0.000000e+00 : f32
    %36 = vector.broadcast %cst_11 : f32 to vector<8x256xf32>
    %37 = arith.subf %36, %35 : vector<8x256xf32>
    %38 = math.log %37 : vector<8x256xf32>
    %39 = vector.extract_strided_slice %38 {offsets = [0, 0], sizes = [8, 128], strides = [1, 1]} : vector<8x256xf32> to vector<8x128xf32>
    %40 = vector.extract_strided_slice %38 {offsets = [0, 128], sizes = [8, 128], strides = [1, 1]} : vector<8x256xf32> to vector<8x128xf32>
    %41 = arith.subf %29, %39 : vector<8x128xf32>
    %cst_12 = arith.constant 1.000000e+02 : f32
    %42 = vector.broadcast %cst_12 : f32 to vector<8x128xf32>
    %43 = arith.mulf %41, %42 : vector<8x128xf32>
    %cst_13 = arith.constant 0xFF800000 : f32
    %44 = vector.broadcast %cst_13 : f32 to vector<8x128xf32>
    %45 = arith.select %6, %43, %44 : vector<8x128xi1>, vector<8x128xf32>
    %46 = arith.subf %29, %40 : vector<8x128xf32>
    %cst_14 = arith.constant 1.000000e+02 : f32
    %47 = vector.broadcast %cst_14 : f32 to vector<8x128xf32>
    %48 = arith.mulf %46, %47 : vector<8x128xf32>
    %cst_15 = arith.constant 0xFF800000 : f32
    %49 = vector.broadcast %cst_15 : f32 to vector<8x128xf32>
    %50 = arith.select %6, %48, %49 : vector<8x128xi1>, vector<8x128xf32>
    %cst_16 = arith.constant dense<0xFF800000> : vector<8xf32>
    %51 = vector.multi_reduction <maximumf>, %45, %cst_16 [1] : vector<8x128xf32> to vector<8xf32>
    %52 = vector.shape_cast %51 : vector<8xf32> to vector<8x1xf32>
    %cst_17 = arith.constant dense<0xFF800000> : vector<8xf32>
    %53 = vector.multi_reduction <maximumf>, %50, %cst_17 [1] : vector<8x128xf32> to vector<8xf32>
    %54 = vector.shape_cast %53 : vector<8xf32> to vector<8x1xf32>
    %55 = vector.broadcast %52 : vector<8x1xf32> to vector<8x128xf32>
    %56 = arith.cmpf oeq, %45, %55 : vector<8x128xf32>
    %c128_i32 = arith.constant 128 : i32
    %57 = vector.broadcast %c128_i32 : i32 to vector<8x128xi32>
    %58 = arith.select %56, %3, %57 : vector<8x128xi1>, vector<8x128xi32>
    %cst_18 = arith.constant dense<2147483647> : vector<8xi32>
    %59 = vector.multi_reduction <minsi>, %58, %cst_18 [1] : vector<8x128xi32> to vector<8xi32>
    %60 = vector.shape_cast %59 : vector<8xi32> to vector<8x1xi32>
    %61 = vector.broadcast %54 : vector<8x1xf32> to vector<8x128xf32>
    %62 = arith.cmpf oeq, %50, %61 : vector<8x128xf32>
    %c128_i32_19 = arith.constant 128 : i32
    %63 = vector.broadcast %c128_i32_19 : i32 to vector<8x128xi32>
    %64 = arith.select %62, %3, %63 : vector<8x128xi1>, vector<8x128xi32>
    %cst_20 = arith.constant dense<2147483647> : vector<8xi32>
    %65 = vector.multi_reduction <minsi>, %64, %cst_20 [1] : vector<8x128xi32> to vector<8xi32>
    %66 = vector.shape_cast %65 : vector<8xi32> to vector<8x1xi32>
    %c0_i32 = arith.constant 0 : i32
    %67 = vector.broadcast %c0_i32 : i32 to vector<8x1xi32>
    %68 = arith.maxsi %60, %67 : vector<8x1xi32>
    %c1_i32 = arith.constant 1 : i32
    %69 = vector.broadcast %c1_i32 : i32 to vector<8x1xi32>
    %70 = arith.subi %1, %69 : vector<8x1xi32>
    %71 = arith.minsi %68, %70 : vector<8x1xi32>
    %c0_i32_21 = arith.constant 0 : i32
    %72 = vector.broadcast %c0_i32_21 : i32 to vector<8x1xi32>
    %73 = arith.maxsi %66, %72 : vector<8x1xi32>
    %c1_i32_22 = arith.constant 1 : i32
    %74 = vector.broadcast %c1_i32_22 : i32 to vector<8x1xi32>
    %75 = arith.subi %1, %74 : vector<8x1xi32>
    %76 = arith.minsi %73, %75 : vector<8x1xi32>
    %77 = vector.broadcast %52 : vector<8x1xf32> to vector<8x128xf32>
    %78 = arith.subf %45, %77 : vector<8x128xf32>
    %79 = math.exp %78 : vector<8x128xf32>
    %80 = vector.broadcast %54 : vector<8x1xf32> to vector<8x128xf32>
    %81 = arith.subf %50, %80 : vector<8x128xf32>
    %82 = math.exp %81 : vector<8x128xf32>
    %cst_23 = arith.constant dense<0.000000e+00> : vector<8xf32>
    %83 = vector.multi_reduction <add>, %79, %cst_23 [1] : vector<8x128xf32> to vector<8xf32>
    %84 = vector.shape_cast %83 : vector<8xf32> to vector<8x1xf32>
    %85 = vector.broadcast %84 : vector<8x1xf32> to vector<8x128xf32>
    %86 = arith.divf %79, %85 : vector<8x128xf32>
    %cst_24 = arith.constant dense<0.000000e+00> : vector<8xf32>
    %87 = vector.multi_reduction <add>, %82, %cst_24 [1] : vector<8x128xf32> to vector<8xf32>
    %88 = vector.shape_cast %87 : vector<8xf32> to vector<8x1xf32>
    %89 = vector.broadcast %88 : vector<8x1xf32> to vector<8x128xf32>
    %90 = arith.divf %82, %89 : vector<8x128xf32>
    %91 = vector.broadcast %71 : vector<8x1xi32> to vector<8x128xi32>
    %92 = arith.cmpi slt, %3, %91 : vector<8x128xi32>
    %93 = arith.andi %92, %6 : vector<8x128xi1>
    %cst_25 = arith.constant 1.000000e+00 : f32
    %cst_26 = arith.constant 0.000000e+00 : f32
    %94 = vector.broadcast %cst_25 : f32 to vector<8x128xf32>
    %95 = vector.broadcast %cst_26 : f32 to vector<8x128xf32>
    %96 = arith.select %93, %94, %95 : vector<8x128xi1>, vector<8x128xf32>
    %97 = vector.broadcast %76 : vector<8x1xi32> to vector<8x128xi32>
    %98 = arith.cmpi sgt, %3, %97 : vector<8x128xi32>
    %99 = arith.andi %98, %6 : vector<8x128xi1>
    %cst_27 = arith.constant 1.000000e+00 : f32
    %cst_28 = arith.constant 0.000000e+00 : f32
    %100 = vector.broadcast %cst_27 : f32 to vector<8x128xf32>
    %101 = vector.broadcast %cst_28 : f32 to vector<8x128xf32>
    %102 = arith.select %99, %100, %101 : vector<8x128xi1>, vector<8x128xf32>
    %cst_29 = arith.constant 1.000000e+00 : f32
    %cst_30 = arith.constant 0.000000e+00 : f32
    %103 = vector.broadcast %cst_29 : f32 to vector<8x128xf32>
    %104 = vector.broadcast %cst_30 : f32 to vector<8x128xf32>
    %105 = arith.select %6, %103, %104 : vector<8x128xi1>, vector<8x128xf32>
    %106 = math.absf %52 : vector<8x1xf32>
    %cst_31 = arith.constant 0x7F800000 : f32
    %107 = vector.broadcast %cst_31 : f32 to vector<8x1xf32>
    %108 = arith.cmpf olt, %106, %107 : vector<8x1xf32>
    %cst_32 = arith.constant dense<true> : vector<8x1xi1>
    %109 = arith.xori %108, %cst_32 : vector<8x1xi1>
    %110 = math.absf %54 : vector<8x1xf32>
    %cst_33 = arith.constant 0x7F800000 : f32
    %111 = vector.broadcast %cst_33 : f32 to vector<8x1xf32>
    %112 = arith.cmpf olt, %110, %111 : vector<8x1xf32>
    %cst_34 = arith.constant dense<true> : vector<8x1xi1>
    %113 = arith.xori %112, %cst_34 : vector<8x1xi1>
    %114 = arith.addf %86, %96 : vector<8x128xf32>
    %115 = vector.shape_cast %109 : vector<8x1xi1> to vector<8x1xi1>
    %116 = vector.broadcast %115 : vector<8x1xi1> to vector<8x128xi1>
    %117 = arith.select %116, %105, %114 : vector<8x128xi1>, vector<8x128xf32>
    %c0_35 = arith.constant 0 : index
    %c0_36 = arith.constant 0 : index
    %118 = vector.load %arg4[%c0_35, %c0_36] : memref<8x128xf32, #tpu.memory_space<vmem>>, vector<8x128xf32>
    tpu.vector_store %arg4[%c0_35, %c0_36], %117 {strides = array<i32>} : memref<8x128xf32, #tpu.memory_space<vmem>>, vector<8x128xf32>,
    %119 = arith.addf %90, %102 : vector<8x128xf32>
    %120 = vector.shape_cast %113 : vector<8x1xi1> to vector<8x1xi1>
    %121 = vector.broadcast %120 : vector<8x1xi1> to vector<8x128xi1>
    %122 = arith.select %121, %105, %119 : vector<8x128xi1>, vector<8x128xf32>
    %c0_37 = arith.constant 0 : index
    %c0_38 = arith.constant 0 : index
    %123 = vector.load %arg5[%c0_37, %c0_38] : memref<8x128xf32, #tpu.memory_space<vmem>>, vector<8x128xf32>
    tpu.vector_store %arg5[%c0_37, %c0_38], %122 {strides = array<i32>} : memref<8x128xf32, #tpu.memory_space<vmem>>, vector<8x128xf32>,
    %124 = tpu.iota {dimensions = array<i32: 1>} : vector<8x128xi32>
    %c0_i32_39 = arith.constant 0 : i32
    %125 = vector.broadcast %c0_i32_39 : i32 to vector<8x128xi32>
    %126 = arith.cmpi eq, %124, %125 : vector<8x128xi32>
    %c1_i32_40 = arith.constant 1 : i32
    %127 = vector.broadcast %c1_i32_40 : i32 to vector<8x128xi32>
    %128 = arith.cmpi eq, %124, %127 : vector<8x128xi32>
    %c0_i32_41 = arith.constant 0 : i32
    %129 = vector.shape_cast %76 : vector<8x1xi32> to vector<8x1xi32>
    %130 = vector.broadcast %129 : vector<8x1xi32> to vector<8x128xi32>
    %131 = vector.broadcast %c0_i32_41 : i32 to vector<8x128xi32>
    %132 = arith.select %128, %130, %131 : vector<8x128xi1>, vector<8x128xi32>
    %133 = vector.shape_cast %71 : vector<8x1xi32> to vector<8x1xi32>
    %134 = vector.broadcast %133 : vector<8x1xi32> to vector<8x128xi32>
    %135 = arith.select %126, %134, %132 : vector<8x128xi1>, vector<8x128xi32>
    %c0_42 = arith.constant 0 : index
    %c0_43 = arith.constant 0 : index
    %136 = vector.load %arg6[%c0_42, %c0_43] : memref<8x128xi32, #tpu.memory_space<vmem>>, vector<8x128xi32>
    tpu.vector_store %arg6[%c0_42, %c0_43], %135 {strides = array<i32>} : memref<8x128xi32, #tpu.memory_space<vmem>>, vector<8x128xi32>,
    return
  }
  func.func @transform_0(%arg0: i32) -> (i32, i32) {
    %c0_i32 = arith.constant 0 : i32
    %c0_i32_0 = arith.constant 0 : i32
    %c0_i32_1 = arith.constant 0 : i32
    return %c0_i32, %c0_i32_0 : i32, i32
  }
  func.func @transform_1(%arg0: i32) -> (i32, i32) {
    %c0_i32 = arith.constant 0 : i32
    %c0_i32_0 = arith.constant 0 : i32
    return %arg0, %c0_i32 : i32, i32
  }
  func.func @transform_2(%arg0: i32) -> (i32, i32) {
    %c0_i32 = arith.constant 0 : i32
    %c0_i32_0 = arith.constant 0 : i32
    return %arg0, %c0_i32 : i32, i32
  }
  func.func @transform_3(%arg0: i32) -> (i32, i32) {
    %c0_i32 = arith.constant 0 : i32
    %c0_i32_0 = arith.constant 0 : i32
    return %arg0, %c0_i32 : i32, i32
  }
  func.func @transform_4(%arg0: i32) -> (i32, i32) {
    %c0_i32 = arith.constant 0 : i32
    %c0_i32_0 = arith.constant 0 : i32
    return %arg0, %c0_i32 : i32, i32
  }
  func.func @transform_5(%arg0: i32) -> (i32, i32) {
    %c0_i32 = arith.constant 0 : i32
    %c0_i32_0 = arith.constant 0 : i32
    return %arg0, %c0_i32 : i32, i32
  }
}

</mosaic_0001>

<bundles_post_ra>
// kernel: _run_kernel.1
= control target key start
LH: loop header
LB: loop body
LE: loop exit
PB: predicated region body
PF: predicated region fallthrough
CT: control target
= control target key end

     0   :  { %12 = vsyncpa [#allocation4], 0  ;;  %s429_s0 = inlined_call_operand.<no memory space> [shape: f32[1,1], index: 0, kind: input, shape index: {}]   ;;  %s430_s1 = inlined_call_operand.vmem [shape: s32[8,1], index: 1, kind: input, shape index: {}]   ;;  %s431_s2 = inlined_call_operand.vmem [shape: f32[8,256], index: 2, kind: input, shape index: {}]   ;;  %s432_s3 = inlined_call_operand.hbm [shape: f32[8,128], index: 3, kind: output, shape index: {0}]   ;;  %s433_s4 = inlined_call_operand.hbm [shape: f32[8,128], index: 4, kind: output, shape index: {1}]   ;;  %s434_s5 = inlined_call_operand.hbm [shape: s32[8,128], index: 5, kind: output, shape index: {2}]  }
   0x1   :  { %v357_v0 = vld [vmem:[%s430_s1] sm:$0xff] }
   0x2   :  { %13 = vsyncpa [#allocation6], 0  ;;  %v318_v1 = vmov 0   ;;  %v22_v2 = vcvt.s32.f32 %v357_v0  ;;  %v31_v4 = vstv %s429_s0  ;;  %s36_s1 = smul.f32 0.33333334, %s429_s0  ;;  %v62_v20 = vld [vmem:[%s431_s2] sm:$0xff]  ;;  %v23_v26 = vlaneseq }
   0x3   :  { %226 = vset.pattern.permute.xlu0 %v318_v1  ;;  %227 = vset.pattern.permute.xlu1 %v318_v1  ;;  %v63_v21 = vld [vmem:[%s431_s2 + $0x8] sm:$0xff]  ;;  %v64_v22 = vmax.f32 %v62_v20, 5.9604645e-08  ;;  %s319_s2 = smov [#allocation3]   ;;  %s321_s28 = smov [#allocation5]  }
   0x4   :  { %27 = vperm.xlu1 %227, %v357_v0   ;;  %228 = vrcp.f32 %v22_v2  ;;  %v218_v3 = vadd.f32 -2.0, %v22_v2  ;;  %v37_v8 = vstv %s36_s1  ;;  %v65_v23 = vmax.f32 %v63_v21, 5.9604645e-08  ;;  %s183_s27 = sshll.u32 %s319_s2, 4  ;;  %s193_s29 = sshll.u32 %s321_s28, 4  ;;  %s184_s27 = int_to_ptr.vmem [resolvable:$true] %s183_s27  ;;  %s194_s29 = int_to_ptr.vmem [resolvable:$true] %s193_s29 }
   0x5   :  { %v66_v24 = vmin.f32 %v64_v22, 0.99999994  ;;  %v373_v27 = vand.u32 127, %v23_v26  ;;  %v219_v22 = vadd.s32 4294967295, %v357_v0  ;;  %s322_s30 = smov [#allocation7]   ;;  %s254_s7 = scalar_lea.vmem %s184_s27, 128 }
   0x6   :  { %v32_v5 = vmul.f32 %v218_v3, %v31_v4  ;;  %v67_v25 = vmin.f32 %v65_v23, 0.99999994  ;;  %s203_s6 = sshll.u32 %s322_s30, 4  ;;  %p255_p0 = scmp.ne.s32.totalorder %s184_s27, %s254_s7  ;;  %s204_s6 = int_to_ptr.vmem [resolvable:$true] %s203_s6 }
   0x7   :  { %v25_v30 = vcvt.s32.f32 %v373_v27  ;;  %vm173_vm9 = vcmp.eq.s32.totalorder %v373_v27, 1  ;;  %vm172_vm10 = vcmp.eq.s32.totalorder %v373_v27, 0  ;;  %p259_p1 = scmp.lt.s32.totalorder %s184_s27, %s184_s27  ;;  %p260_p2 = scmp.lt.s32.totalorder %s254_s7, %s254_s7 }
   0x9   :  { %p261_p3 = por %p260_p2, %p259_p1 }
   0xb   :  { %p262_p4 = pnand %p261_p3, %p255_p0 }
  0x11   :  { %v229_v6 = vpop.eup %228 }
  0x12   :  { %v34_v7 = vmul.f32 %v229_v6, %v32_v5 }
  0x14   :  { %v35_v9 = vadd.f32 0.75, %v34_v7 }
  0x16   :  { %v38_v10 = vsub.f32 %v35_v9, %v37_v8 }
  0x18   :  { %230 = vlog2.f32 %v38_v10  ;;  %v53_v17 = vsub.f32 1.0, %v38_v10 }
  0x25   :  { %v231_v11 = vpop.eup %230 }
  0x26   :  { %v40_v12 = vmul.f32 0.6931472, %v231_v11 }
  0x28   :  { %47 = vperm.xlu0 %226, %v40_v12   ;;  %v41_v13 = vmul.f32 %v40_v12, %v22_v2 }
  0x2a   :  { %v42_v14 = vmul.f32 1.442695, %v41_v13 }
  0x2c   :  { %232 = vpow2.f32 %v42_v14 }
  0x39   :  { %v233_v15 = vpop.eup %232 }
  0x3a   :  { %v44_v16 = vsub.f32 1.0, %v233_v15 }
  0x3c   :  { %234 = vrcp.f32 %v44_v16 }
  0x3d   :  { %236 = vlog2.f32 %v66_v24 }
  0x3e   :  { %238 = vlog2.f32 %v67_v25 }
  0x49   :  { %v235_v18 = vpop.eup %234 }
  0x4a   :  { %v55_v19 = vmul.f32 %v235_v18, %v53_v17  ;;  %v237_v28 = vpop.eup %236 }
  0x4b   :  { %v239_v29 = vpop.eup %238  ;;  %v69_v32 = vmul.f32 0.6931472, %v237_v28 }
  0x4c   :  { %58 = vperm.xlu0 %226, %v55_v19   ;;  %v71_v33 = vmul.f32 0.6931472, %v239_v29 }
  0x4d   :  { %v72_v35 = vsub.f32 0.0, %v69_v32 }
  0x4e   :  { %v73_v36 = vsub.f32 0.0, %v71_v33 }
  0x4f   :  { %240 = vlog2.f32 %v72_v35 }
  0x50   :  { %242 = vlog2.f32 %v73_v36 }
  0x5c   :  { %v241_v38 = vpop.eup %240 }
  0x5d   :  { %v243_v39 = vpop.eup %242  ;;  %v75_v41 = vmul.f32 0.6931472, %v241_v38 }
  0x5e   :  { %v77_v42 = vmul.f32 0.6931472, %v243_v39 }
  0x7f   :  { %v28_v45 = vpop.permute.xlu1 %27 }
  0x80   :  { %vm377_vm0 = vcmp.lt.s32.totalorder %v373_v27, %v28_v45 }
  0xa3   :  { %v48_v31 = vpop.permute.xlu0 %47 }
  0xa4   :  { %v50_v34 = vmul.f32 %v48_v31, %v25_v30 }
  0xa6   :  { %v51_v37 = vmul.f32 1.442695, %v50_v34 }
  0xa8   :  { %244 = vpow2.f32 %v51_v37 }
  0xb5   :  { %v245_v40 = vpop.eup %244 }
  0xc7   :  { %v59_v43 = vpop.permute.xlu0 %58 }
  0xc8   :  { %v61_v44 = vmul.f32 %v245_v40, %v59_v43  ;;  %v320_v40 = vmov 0.0  }
  0xc9   :  { %v155_v45 = vsel %vm377_vm0, 1.0, %v320_v40 }
  0xca   :  { %v78_v46 = vsub.f32 %v61_v44, %v75_v41  ;;  %v81_v47 = vsub.f32 %v61_v44, %v77_v42 }
  0xcc   :  { %v79_v49 = vmul.f32 100.0, %v78_v46  ;;  %v82_v50 = vmul.f32 100.0, %v81_v47 }
  0xce   :  { %v83_v51 = vsel %vm377_vm0, %v82_v50, -inf  ;;  %v80_v52 = vsel %vm377_vm0, %v79_v49, -inf }
  0xcf   :  { %86 = vmax.xlane.f32.xlu1 %v83_v51  ;;  %84 = vmax.xlane.f32.xlu0 %v80_v52 }
 0x158   :  { %v385_v53 = vpop.xlane.xlu1 %86  ;;  %v387_v54 = vpop.xlane.xlu0 %84 }
 0x159   :  { %vm104_vm1 = vcmp.eq.f32.partialorder %v83_v51, %v385_v53  ;;  %vm88_vm2 = vcmp.eq.f32.partialorder %v80_v52, %v387_v54  ;;  %v132_v61 = vsub.f32 %v83_v51, %v385_v53  ;;  %v129_v62 = vsub.f32 %v80_v52, %v387_v54 }
 0x15a   :  { %v105_v55 = vsel %vm104_vm1, %v373_v27, 128  ;;  %v89_v56 = vsel %vm88_vm2, %v373_v27, 128  ;;  %v156_v30 = vand.u32 2147483647, %v387_v54  ;;  %v159_v0 = vand.u32 2147483647, %v385_v53 }
 0x15b   :  { %v107_v57 = vshra.s32 %v105_v55, 16  ;;  %v91_v58 = vshra.s32 %v89_v56, 16  ;;  %v133_v63 = vmul.f32 1.442695, %v132_v61  ;;  %v130_v1 = vmul.f32 1.442695, %v129_v62 }
 0x15c   :  { %v90_v2 = vand.u32 65535, %v89_v56  ;;  %v106_v3 = vand.u32 65535, %v105_v55  ;;  %vm404_vm14 = vcmp.lt.f32.partialorder %v156_v30, inf  ;;  %vm408_vm15 = vcmp.lt.f32.partialorder %v159_v0, inf }
 0x15d   :  { %v109_v59 = vcvt.s32.f32 %v107_v57  ;;  %v93_v60 = vcvt.s32.f32 %v91_v58  ;;  %246 = vpow2.f32 %v133_v63  ;;  %vm323_vm2 = vmmov 1  }
 0x15e   :  { %248 = vpow2.f32 %v130_v1  ;;  %v92_v6 = vcvt.s32.f32 %v90_v2  ;;  %v108_v7 = vcvt.s32.f32 %v106_v3 }
 0x15f   :  { %110 = vmin.xlane.f32.xlu0 %v109_v59  ;;  %94 = vmin.xlane.f32.xlu1 %v93_v60 }
 0x16a   :  { %v247_v10 = vpop.eup %246 }
 0x16b   :  { %v249_v11 = vpop.eup %248 }
 0x1e8   :  { %v95_v4 = vpop.xlane.xlu1 %94  ;;  %v111_v5 = vpop.xlane.xlu0 %110 }
 0x1e9   :  { %vm96_vm3 = vcmp.eq.f32.partialorder %v93_v60, %v95_v4  ;;  %vm112_vm4 = vcmp.eq.f32.partialorder %v109_v59, %v111_v5  ;;  %v101_v12 = vcvt.f32.s32 %v95_v4  ;;  %v117_v13 = vcvt.f32.s32 %v111_v5 }
 0x1ea   :  { %v97_v8 = vsel %vm96_vm3, %v92_v6, inf  ;;  %v113_v9 = vsel %vm112_vm4, %v108_v7, inf  ;;  %vm158_vm3 = vmxor %vm404_vm14, %vm323_vm2 }
 0x1eb   :  { %98 = vmin.xlane.f32.xlu1 %v97_v8  ;;  %114 = vmin.xlane.f32.xlu0 %v113_v9  ;;  %v102_v16 = vshll.u32 %v101_v12, 16  ;;  %v118_v17 = vshll.u32 %v117_v13, 16  ;;  %vm161_vm4 = vmxor %vm408_vm15, %vm323_vm2 }
 0x1ef   :  { %135 = vadd.xlane.f32.xlu1 %v249_v11  ;;  %139 = vadd.xlane.f32.xlu0 %v247_v10 }
 0x274   :  { %v99_v14 = vpop.xlane.xlu1 %98  ;;  %v115_v15 = vpop.xlane.xlu0 %114 }
 0x275   :  { %v100_v18 = vcvt.f32.s32 %v99_v14  ;;  %v116_v19 = vcvt.f32.s32 %v115_v15 }
 0x277   :  { %v103_v20 = vadd.s32 %v102_v16, %v100_v18  ;;  %v119_v21 = vadd.s32 %v118_v17, %v116_v19 }
 0x278   :  { %v136_v28 = vpop.xlane.xlu1 %135  ;;  %v140_v29 = vpop.xlane.xlu0 %139 }
 0x279   :  { %vm120_vm5 = vcmp.gt.s32.totalorder %v103_v20, 0  ;;  %vm125_vm6 = vcmp.gt.s32.totalorder %v119_v21, 0  ;;  %250 = vrcp.f32 %v136_v28 }
 0x27a   :  { %v121_v23 = vsel %vm120_vm5, %v103_v20, 0  ;;  %v126_v24 = vsel %vm125_vm6, %v119_v21, 0  ;;  %252 = vrcp.f32 %v140_v29 }
 0x27b   :  { %vm123_vm7 = vcmp.lt.s32.totalorder %v121_v23, %v219_v22  ;;  %vm127_vm8 = vcmp.lt.s32.totalorder %v126_v24, %v219_v22 }
 0x27c   :  { %v124_v25 = vsel %vm123_vm7, %v121_v23, %v219_v22  ;;  %v128_v26 = vsel %vm127_vm8, %v126_v24, %v219_v22 }
 0x27d   :  { %144 = vperm.xlu1 %227, %v124_v25   ;;  %150 = vperm.xlu0 %226, %v128_v26  }
 0x286   :  { %v251_v31 = vpop.eup %250 }
 0x287   :  { %v253_v32 = vpop.eup %252  ;;  %v138_v36 = vmul.f32 %v251_v31, %v249_v11 }
 0x288   :  { %v142_v42 = vmul.f32 %v253_v32, %v247_v10 }
 0x2f8   :  { %v145_v33 = vpop.permute.xlu1 %144  ;;  %v151_v34 = vpop.permute.xlu0 %150 }
 0x2f9   :  { %vm146_vm11 = vcmp.lt.s32.totalorder %v373_v27, %v145_v33  ;;  %vm152_vm12 = vcmp.gt.s32.totalorder %v373_v27, %v151_v34  ;;  %v174_v35 = vsel %vm173_vm9, %v151_v34, 0 }
 0x2fa   :  { %vm147_vm13 = vmand %vm146_vm11, %vm377_vm0  ;;  %v175_v38 = vsel %vm172_vm10, %v145_v33, %v174_v35 }
 0x2fb   :  { %v148_v41 = vsel %vm147_vm13, 1.0, %v320_v40  ;;  %vm153_vm1 = vmand %vm152_vm12, %vm377_vm0  ;;  %176 = vst [vmem:[#allocation7] sm:$0xff] %v175_v38 }
 0x2fc   :  { %v162_v27 = vadd.f32 %v148_v41, %v138_v36  ;;  %v154_v43 = vsel %vm153_vm1, 1.0, %v320_v40 }
 0x2fd   :  { %v167_v44 = vadd.f32 %v154_v43, %v142_v42 }
 0x2fe   :  { %v165_v46 = vsel %vm158_vm3, %v155_v45, %v162_v27 }
 0x2ff   :  { %v170_v47 = vsel %vm161_vm4, %v155_v45, %v167_v44  ;;  %166 = vst [vmem:[#allocation3] sm:$0xff] %v165_v46 }
 0x300   :  { %171 = vst [vmem:[#allocation5] sm:$0xff] %v170_v47 }
 0x301   :  { %265 = shalt.err (!%p262_p4)
}
 0x302   :  { %186 = dma.vmem_to_hbm [thread:$0]  %s184_s27, 128, %s432_s3, [#allocation4]  }
 0x303   :  { %s274_s10 = scalar_lea.vmem %s194_s29, 128  ;;  %p279_p6 = scmp.lt.s32.totalorder %s194_s29, %s194_s29 }
 0x304   :  { %p275_p5 = scmp.ne.s32.totalorder %s194_s29, %s274_s10  ;;  %p280_p7 = scmp.lt.s32.totalorder %s274_s10, %s274_s10 }
 0x306   :  { %p281_p8 = por %p280_p7, %p279_p6 }
 0x308   :  { %p282_p9 = pnand %p281_p8, %p275_p5 }
 0x30a   :  { %285 = shalt.err (!%p282_p9)
}
 0x30b   :  { %196 = dma.vmem_to_hbm [thread:$0]  %s194_s29, 128, %s433_s4, [#allocation6]  }
 0x30c   :  { %s294_s13 = scalar_lea.vmem %s204_s6, 128  ;;  %p299_p11 = scmp.lt.s32.totalorder %s204_s6, %s204_s6 }
 0x30d   :  { %p295_p10 = scmp.ne.s32.totalorder %s204_s6, %s294_s13  ;;  %p300_p12 = scmp.lt.s32.totalorder %s294_s13, %s294_s13 }
 0x30f   :  { %p301_p13 = por %p300_p12, %p299_p11 }
 0x311   :  { %p302_p0 = pnand %p301_p13, %p295_p10 }
 0x313   :  { %305 = shalt.err (!%p302_p0)
}
 0x314   :  { %206 = dma.vmem_to_hbm [thread:$0]  %s204_s6, 128, %s434_s5, [#allocation6]  }
 0x315   :  { %314 = dma.done.wait [#allocation4], 128  }
 0x316   :  { %315 = vsyncadd [#allocation4], 4294967168 }
 0x317   :  { %316 = dma.done.wait [#allocation6], 256  }
 0x318   :  { %317 = vsyncadd [#allocation6], 4294967040 }
 0x319   :  { %216 = vsyncpa [#allocation4], 1 }
 0x31a   :  { %217 = vsyncpa [#allocation6], 1 }

</bundles_post_ra>
